<compile_context>
chip_gen: v7x
topology: tpu7x:2x2x1
jax: 0.10.0
libtpu: 0.0.40
codegen_flags: <defaults>
</compile_context>

<pallas_src>
import functools

import jax
import jax.numpy as jnp
from jax.experimental import pallas as pl
from jax.experimental.pallas import tpu as pltpu

GRAVITY = 9.81
L = 1.0
DT = 0.01
OBS_DIM = 12
HIDDEN_DIM = 30
LATENT_DIM = 3
DEFAULT_TILE_B = 512


def _round_up(n, m):
    return ((n + m - 1) // m) * m


def _informed_kernel(k, dt, g, length,
                     x_ref, we1_ref, be1_ref, we2_ref, be2_ref,
                     wd1_ref, bd1_ref, wd2_ref, bd2_ref, o_ref):
    # Weights/biases are resident in VMEM for the whole grid (index_map -> (0,0)).
    # Load them once, outside the fused k-loop.
    we1 = we1_ref[...]          # (HIDDEN, OBS)
    be1 = be1_ref[...]          # (HIDDEN, 1)
    we2 = we2_ref[...]          # (LATENT, HIDDEN)
    be2 = be2_ref[...]          # (LATENT, 1)
    wd1 = wd1_ref[...]          # (HIDDEN, LATENT)
    bd1 = bd1_ref[...]          # (HIDDEN, 1)
    wd2 = wd2_ref[...]          # (OBS, HIDDEN)
    bd2 = bd2_ref[...]          # (OBS, 1)

    # Decoder layer-1 columns as (HIDDEN, 1) vectors, hoisted out of the k-loop:
    # the K=3 matmul + concat is replaced by three VPU rank-1 broadcast-MACs.
    wd1_c = wd1[:, 0:1]
    wd1_s = wd1[:, 1:2]
    wd1_t = wd1[:, 2:3]

    neg_g_over_l = -(g / length)            # python float, hoisted
    half_pi = jnp.float32(jnp.pi / 2.0)

    def step(_, x):                         # x: (OBS, TILE_B), lane-dense
        # ---------------- encoder: Linear -> ReLU -> Linear ----------------
        h = jnp.dot(we1, x, preferred_element_type=jnp.float32) + be1
        h = jnp.maximum(h, 0.0)
        z = jnp.dot(we2, h, preferred_element_type=jnp.float32) + be2   # (3, B)

        # -------- InformedDynamics: one symplectic pendulum step -----------
        zx = z[0:1, :]                      # sublane slices: cheap
        zy = z[1:2, :]
        td = z[2:3, :]
        sq = zx * zx + zy * zy
        is_zero = sq == 0.0
        inv_r = jax.lax.rsqrt(jnp.where(is_zero, 1.0, sq))
        ux = jnp.where(is_zero, 1.0, zx * inv_r)    # cos(atan2(zy, zx))
        uy = jnp.where(is_zero, 0.0, zy * inv_r)    # sin(atan2(zy, zx))
        # theta1 = theta0 + td*dt = atan2(zy, zx) + (pi/2 + td*dt)
        phi = half_pi + td * dt
        cphi = jnp.cos(phi)
        sphi = jnp.sin(phi)
        sin_t1 = uy * cphi + ux * sphi              # sin(theta1)
        cos_t1 = ux * cphi - uy * sphi              # cos(theta1)
        td_new = td + dt * (neg_g_over_l * sin_t1)  # theta_dot update (post-angle)

        # ------------- decoder: rank-1 layer (VPU) -> ReLU -> Linear --------
        h2 = wd1_c * cos_t1 + wd1_s * sin_t1 + wd1_t * td_new + bd1
        h2 = jnp.maximum(h2, 0.0)
        return jnp.dot(wd2, h2, preferred_element_type=jnp.float32) + bd2

    o_ref[...] = jax.lax.fori_loop(0, k, step, x_ref[...])


def init_params(key):
    """PyTorch-style nn.Linear init: U(-1/sqrt(fan_in), 1/sqrt(fan_in)).

    Weights are kept in the native PyTorch (out, in) layout; biases are
    (out, 1) so they broadcast along the lane (batch) axis inside the kernel.
    """
    ks = jax.random.split(key, 8)

    def lin(kw, kb, fan_in, fan_out):
        bound = 1.0 / float(fan_in) ** 0.5
        w = jax.random.uniform(kw, (fan_out, fan_in), jnp.float32, -bound, bound)
        b = jax.random.uniform(kb, (fan_out,), jnp.float32, -bound, bound)
        return w, b.reshape(fan_out, 1)

    we1, be1 = lin(ks[0], ks[1], OBS_DIM, HIDDEN_DIM)      # encoder layer 1
    we2, be2 = lin(ks[2], ks[3], HIDDEN_DIM, LATENT_DIM)   # encoder layer 2
    wd1, bd1 = lin(ks[4], ks[5], LATENT_DIM, HIDDEN_DIM)   # decoder layer 1
    wd2, bd2 = lin(ks[6], ks[7], HIDDEN_DIM, OBS_DIM)      # decoder layer 2
    return (we1, be1, we2, be2, wd1, bd1, wd2, bd2)


def informed_end2end(x, params, k=1, dt=DT, g=GRAVITY, length=L,
                     tile_b=DEFAULT_TILE_B):
    """Forward pass of InformedEnd2End: k fused repetitions of enc -> dyn -> dec."""
    we1, be1, we2, be2, wd1, bd1, wd2, bd2 = params
    b = x.shape[0]
    tb = min(tile_b, _round_up(max(b, 1), 128))    # lane tile, multiple of 128
    b_pad = _round_up(max(b, 1), tb)
    xp = jnp.pad(x.astype(jnp.float32), ((0, b_pad - b), (0, 0)))
    x_t = xp.T                                     # (OBS_DIM, b_pad): batch on lanes

    def resident(shape):                           # weights stay put across the grid
        return pl.BlockSpec(shape, lambda i: (0, 0))

    out_t = pl.pallas_call(
        functools.partial(_informed_kernel, int(k), float(dt), float(g), float(length)),
        out_shape=jax.ShapeDtypeStruct((OBS_DIM, b_pad), jnp.float32),
        grid=(b_pad // tb,),
        in_specs=[
            pl.BlockSpec((OBS_DIM, tb), lambda i: (0, i)),
            resident((HIDDEN_DIM, OBS_DIM)), resident((HIDDEN_DIM, 1)),
            resident((LATENT_DIM, HIDDEN_DIM)), resident((LATENT_DIM, 1)),
            resident((HIDDEN_DIM, LATENT_DIM)), resident((HIDDEN_DIM, 1)),
            resident((OBS_DIM, HIDDEN_DIM)), resident((OBS_DIM, 1)),
        ],
        out_specs=pl.BlockSpec((OBS_DIM, tb), lambda i: (0, i)),
        compiler_params=pltpu.CompilerParams(
            dimension_semantics=("parallel",),     # megacore sharding on v7x
        ),
    )(x_t, we1, be1, we2, be2, wd1, bd1, wd2, bd2)

    return out_t.T[:b]


if __name__ == "__main__":
    key = jax.random.PRNGKey(0)
    kx, kp = jax.random.split(key)
    batch = 8
    x = jax.random.normal(kx, (batch, OBS_DIM), dtype=jnp.float32)
    params = init_params(kp)

    out = informed_end2end(x, params, k=2)
    jax.block_until_ready(out)
    assert out.shape == (batch, OBS_DIM)
    assert bool(jnp.isfinite(out).all())
    print("KERNEL_OK")
</pallas_src>

<mosaic_0001>
module attributes {stable_mosaic.version = 11 : i64} {
  func.func @_informed_kernel(%arg0: i32, %arg1: memref<12x128xf32, #tpu.memory_space<vmem>>, %arg2: memref<30x12xf32, #tpu.memory_space<vmem>>, %arg3: memref<30x1xf32, #tpu.memory_space<vmem>>, %arg4: memref<3x30xf32, #tpu.memory_space<vmem>>, %arg5: memref<3x1xf32, #tpu.memory_space<vmem>>, %arg6: memref<30x3xf32, #tpu.memory_space<vmem>>, %arg7: memref<30x1xf32, #tpu.memory_space<vmem>>, %arg8: memref<12x30xf32, #tpu.memory_space<vmem>>, %arg9: memref<12x1xf32, #tpu.memory_space<vmem>>, %arg10: memref<12x128xf32, #tpu.memory_space<vmem>>) attributes {dimension_semantics = [#tpu.dimension_semantics<parallel>], iteration_bounds = array<i64: 1>, scalar_prefetch = 0 : i64, scratch_operands = 0 : i64, tpu.core_type = #tpu.core_type<tc>, window_params = [{transform_indices = @transform_0, window_bounds = array<i64: 12, 128>}, {pipeline_mode = #tpu.pipeline_mode<synchronous>, transform_indices = @transform_1, window_bounds = array<i64: 30, 12>}, {pipeline_mode = #tpu.pipeline_mode<synchronous>, transform_indices = @transform_2, window_bounds = array<i64: 30, 1>}, {pipeline_mode = #tpu.pipeline_mode<synchronous>, transform_indices = @transform_3, window_bounds = array<i64: 3, 30>}, {pipeline_mode = #tpu.pipeline_mode<synchronous>, transform_indices = @transform_4, window_bounds = array<i64: 3, 1>}, {pipeline_mode = #tpu.pipeline_mode<synchronous>, transform_indices = @transform_5, window_bounds = array<i64: 30, 3>}, {pipeline_mode = #tpu.pipeline_mode<synchronous>, transform_indices = @transform_6, window_bounds = array<i64: 30, 1>}, {pipeline_mode = #tpu.pipeline_mode<synchronous>, transform_indices = @transform_7, window_bounds = array<i64: 12, 30>}, {pipeline_mode = #tpu.pipeline_mode<synchronous>, transform_indices = @transform_8, window_bounds = array<i64: 12, 1>}, {transform_indices = @transform_9, window_bounds = array<i64: 12, 128>}]} {
    %c0 = arith.constant 0 : index
    %c0_0 = arith.constant 0 : index
    %0 = vector.load %arg2[%c0, %c0_0] : memref<30x12xf32, #tpu.memory_space<vmem>>, vector<30x12xf32>
    %c0_1 = arith.constant 0 : index
    %c0_2 = arith.constant 0 : index
    %1 = vector.load %arg3[%c0_1, %c0_2] : memref<30x1xf32, #tpu.memory_space<vmem>>, vector<30x1xf32>
    %c0_3 = arith.constant 0 : index
    %c0_4 = arith.constant 0 : index
    %2 = vector.load %arg4[%c0_3, %c0_4] : memref<3x30xf32, #tpu.memory_space<vmem>>, vector<3x30xf32>
    %c0_5 = arith.constant 0 : index
    %c0_6 = arith.constant 0 : index
    %3 = vector.load %arg5[%c0_5, %c0_6] : memref<3x1xf32, #tpu.memory_space<vmem>>, vector<3x1xf32>
    %c0_7 = arith.constant 0 : index
    %c0_8 = arith.constant 0 : index
    %4 = vector.load %arg6[%c0_7, %c0_8] : memref<30x3xf32, #tpu.memory_space<vmem>>, vector<30x3xf32>
    %c0_9 = arith.constant 0 : index
    %c0_10 = arith.constant 0 : index
    %5 = vector.load %arg7[%c0_9, %c0_10] : memref<30x1xf32, #tpu.memory_space<vmem>>, vector<30x1xf32>
    %c0_11 = arith.constant 0 : index
    %c0_12 = arith.constant 0 : index
    %6 = vector.load %arg8[%c0_11, %c0_12] : memref<12x30xf32, #tpu.memory_space<vmem>>, vector<12x30xf32>
    %c0_13 = arith.constant 0 : index
    %c0_14 = arith.constant 0 : index
    %7 = vector.load %arg9[%c0_13, %c0_14] : memref<12x1xf32, #tpu.memory_space<vmem>>, vector<12x1xf32>
    %8 = vector.extract_strided_slice %4 {offsets = [0, 0], sizes = [30, 1], strides = [1, 1]} : vector<30x3xf32> to vector<30x1xf32>
    %9 = vector.extract_strided_slice %4 {offsets = [0, 1], sizes = [30, 1], strides = [1, 1]} : vector<30x3xf32> to vector<30x1xf32>
    %10 = vector.extract_strided_slice %4 {offsets = [0, 2], sizes = [30, 1], strides = [1, 1]} : vector<30x3xf32> to vector<30x1xf32>
    %c0_15 = arith.constant 0 : index
    %c0_16 = arith.constant 0 : index
    %11 = vector.load %arg1[%c0_15, %c0_16] : memref<12x128xf32, #tpu.memory_space<vmem>>, vector<12x128xf32>
    %cst = arith.constant 1.57079637 : f32
    %c0_i32 = arith.constant 0 : i32
    %c2_i32 = arith.constant 2 : i32
    %12 = arith.addi %c0_i32, %c2_i32 : i32
    %c1_i32 = arith.constant 1 : i32
    %13 = scf.for %arg11 = %c0_i32 to %12 step %c1_i32 iter_args(%arg12 = %11) -> (vector<12x128xf32>)  : i32 {
      %cst_19 = arith.constant dense<0.000000e+00> : vector<30x128xf32>
      %15 = tpu.matmul %0, %arg12, %cst_19 {dimension_numbers = #tpu.dot_dimension_numbers<[1], [0], [0], [1], [0, 0, 1, 1], [], []>} : vector<30x12xf32>, vector<12x128xf32>, vector<30x128xf32> -> vector<30x128xf32>
      %16 = vector.broadcast %1 : vector<30x1xf32> to vector<30x128xf32>
      %17 = arith.addf %15, %16 : vector<30x128xf32>
      %cst_20 = arith.constant 0.000000e+00 : f32
      %18 = vector.broadcast %cst_20 : f32 to vector<30x128xf32>
      %19 = arith.maximumf %17, %18 : vector<30x128xf32>
      %cst_21 = arith.constant dense<0.000000e+00> : vector<3x128xf32>
      %20 = tpu.matmul %2, %19, %cst_21 {dimension_numbers = #tpu.dot_dimension_numbers<[1], [0], [0], [1], [0, 0, 1, 1], [], []>} : vector<3x30xf32>, vector<30x128xf32>, vector<3x128xf32> -> vector<3x128xf32>
      %21 = vector.broadcast %3 : vector<3x1xf32> to vector<3x128xf32>
      %22 = arith.addf %20, %21 : vector<3x128xf32>
      %23 = vector.extract_strided_slice %22 {offsets = [0, 0], sizes = [1, 128], strides = [1, 1]} : vector<3x128xf32> to vector<1x128xf32>
      %24 = vector.extract_strided_slice %22 {offsets = [1, 0], sizes = [1, 128], strides = [1, 1]} : vector<3x128xf32> to vector<1x128xf32>
      %25 = vector.extract_strided_slice %22 {offsets = [2, 0], sizes = [1, 128], strides = [1, 1]} : vector<3x128xf32> to vector<1x128xf32>
      %26 = arith.mulf %23, %23 : vector<1x128xf32>
      %27 = arith.mulf %24, %24 : vector<1x128xf32>
      %28 = arith.addf %26, %27 : vector<1x128xf32>
      %cst_22 = arith.constant 0.000000e+00 : f32
      %29 = vector.broadcast %cst_22 : f32 to vector<1x128xf32>
      %30 = arith.cmpf oeq, %28, %29 : vector<1x128xf32>
      %cst_23 = arith.constant 1.000000e+00 : f32
      %31 = vector.broadcast %cst_23 : f32 to vector<1x128xf32>
      %32 = arith.select %30, %31, %28 : vector<1x128xi1>, vector<1x128xf32>
      %33 = math.rsqrt %32 : vector<1x128xf32>
      %34 = arith.mulf %23, %33 : vector<1x128xf32>
      %cst_24 = arith.constant 1.000000e+00 : f32
      %35 = vector.broadcast %cst_24 : f32 to vector<1x128xf32>
      %36 = arith.select %30, %35, %34 : vector<1x128xi1>, vector<1x128xf32>
      %37 = arith.mulf %24, %33 : vector<1x128xf32>
      %cst_25 = arith.constant 0.000000e+00 : f32
      %38 = vector.broadcast %cst_25 : f32 to vector<1x128xf32>
      %39 = arith.select %30, %38, %37 : vector<1x128xi1>, vector<1x128xf32>
      %cst_26 = arith.constant 0.00999999977 : f32
      %40 = vector.broadcast %cst_26 : f32 to vector<1x128xf32>
      %41 = arith.mulf %25, %40 : vector<1x128xf32>
      %42 = vector.broadcast %cst : f32 to vector<1x128xf32>
      %43 = arith.addf %42, %41 : vector<1x128xf32>
      %44 = math.cos %43 : vector<1x128xf32>
      %45 = math.sin %43 : vector<1x128xf32>
      %46 = arith.mulf %39, %44 : vector<1x128xf32>
      %47 = arith.mulf %36, %45 : vector<1x128xf32>
      %48 = arith.addf %46, %47 : vector<1x128xf32>
      %49 = arith.mulf %36, %44 : vector<1x128xf32>
      %50 = arith.mulf %39, %45 : vector<1x128xf32>
      %51 = arith.subf %49, %50 : vector<1x128xf32>
      %cst_27 = arith.constant -9.810000e+00 : f32
      %52 = vector.broadcast %cst_27 : f32 to vector<1x128xf32>
      %53 = arith.mulf %52, %48 : vector<1x128xf32>
      %cst_28 = arith.constant 0.00999999977 : f32
      %54 = vector.broadcast %cst_28 : f32 to vector<1x128xf32>
      %55 = arith.mulf %54, %53 : vector<1x128xf32>
      %56 = arith.addf %25, %55 : vector<1x128xf32>
      %57 = vector.broadcast %8 : vector<30x1xf32> to vector<30x128xf32>
      %58 = vector.broadcast %51 : vector<1x128xf32> to vector<30x128xf32>
      %59 = arith.mulf %57, %58 : vector<30x128xf32>
      %60 = vector.broadcast %9 : vector<30x1xf32> to vector<30x128xf32>
      %61 = vector.broadcast %48 : vector<1x128xf32> to vector<30x128xf32>
      %62 = arith.mulf %60, %61 : vector<30x128xf32>
      %63 = arith.addf %59, %62 : vector<30x128xf32>
      %64 = vector.broadcast %10 : vector<30x1xf32> to vector<30x128xf32>
      %65 = vector.broadcast %56 : vector<1x128xf32> to vector<30x128xf32>
      %66 = arith.mulf %64, %65 : vector<30x128xf32>
      %67 = arith.addf %63, %66 : vector<30x128xf32>
      %68 = vector.broadcast %5 : vector<30x1xf32> to vector<30x128xf32>
      %69 = arith.addf %67, %68 : vector<30x128xf32>
      %cst_29 = arith.constant 0.000000e+00 : f32
      %70 = vector.broadcast %cst_29 : f32 to vector<30x128xf32>
      %71 = arith.maximumf %69, %70 : vector<30x128xf32>
      %cst_30 = arith.constant dense<0.000000e+00> : vector<12x128xf32>
      %72 = tpu.matmul %6, %71, %cst_30 {dimension_numbers = #tpu.dot_dimension_numbers<[1], [0], [0], [1], [0, 0, 1, 1], [], []>} : vector<12x30xf32>, vector<30x128xf32>, vector<12x128xf32> -> vector<12x128xf32>
      %73 = vector.broadcast %7 : vector<12x1xf32> to vector<12x128xf32>
      %74 = arith.addf %72, %73 : vector<12x128xf32>
      scf.yield %74 : vector<12x128xf32>
    }
    %c0_17 = arith.constant 0 : index
    %c0_18 = arith.constant 0 : index
    %14 = vector.load %arg10[%c0_17, %c0_18] : memref<12x128xf32, #tpu.memory_space<vmem>>, vector<12x128xf32>
    tpu.vector_store %arg10[%c0_17, %c0_18], %13 {strides = array<i32>} : memref<12x128xf32, #tpu.memory_space<vmem>>, vector<12x128xf32>,
    return
  }
  func.func @transform_0(%arg0: i32) -> (i32, i32) {
    %c0_i32 = arith.constant 0 : i32
    %c0_i32_0 = arith.constant 0 : i32
    return %c0_i32, %arg0 : i32, i32
  }
  func.func @transform_1(%arg0: i32) -> (i32, i32) {
    %c0_i32 = arith.constant 0 : i32
    %c0_i32_0 = arith.constant 0 : i32
    %c0_i32_1 = arith.constant 0 : i32
    return %c0_i32, %c0_i32_0 : i32, i32
  }
  func.func @transform_2(%arg0: i32) -> (i32, i32) {
    %c0_i32 = arith.constant 0 : i32
    %c0_i32_0 = arith.constant 0 : i32
    %c0_i32_1 = arith.constant 0 : i32
    return %c0_i32, %c0_i32_0 : i32, i32
  }
  func.func @transform_3(%arg0: i32) -> (i32, i32) {
    %c0_i32 = arith.constant 0 : i32
    %c0_i32_0 = arith.constant 0 : i32
    %c0_i32_1 = arith.constant 0 : i32
    return %c0_i32, %c0_i32_0 : i32, i32
  }
  func.func @transform_4(%arg0: i32) -> (i32, i32) {
    %c0_i32 = arith.constant 0 : i32
    %c0_i32_0 = arith.constant 0 : i32
    %c0_i32_1 = arith.constant 0 : i32
    return %c0_i32, %c0_i32_0 : i32, i32
  }
  func.func @transform_5(%arg0: i32) -> (i32, i32) {
    %c0_i32 = arith.constant 0 : i32
    %c0_i32_0 = arith.constant 0 : i32
    %c0_i32_1 = arith.constant 0 : i32
    return %c0_i32, %c0_i32_0 : i32, i32
  }
  func.func @transform_6(%arg0: i32) -> (i32, i32) {
    %c0_i32 = arith.constant 0 : i32
    %c0_i32_0 = arith.constant 0 : i32
    %c0_i32_1 = arith.constant 0 : i32
    return %c0_i32, %c0_i32_0 : i32, i32
  }
  func.func @transform_7(%arg0: i32) -> (i32, i32) {
    %c0_i32 = arith.constant 0 : i32
    %c0_i32_0 = arith.constant 0 : i32
    %c0_i32_1 = arith.constant 0 : i32
    return %c0_i32, %c0_i32_0 : i32, i32
  }
  func.func @transform_8(%arg0: i32) -> (i32, i32) {
    %c0_i32 = arith.constant 0 : i32
    %c0_i32_0 = arith.constant 0 : i32
    %c0_i32_1 = arith.constant 0 : i32
    return %c0_i32, %c0_i32_0 : i32, i32
  }
  func.func @transform_9(%arg0: i32) -> (i32, i32) {
    %c0_i32 = arith.constant 0 : i32
    %c0_i32_0 = arith.constant 0 : i32
    return %c0_i32, %arg0 : i32, i32
  }
}

</mosaic_0001>

<bundles_post_ra>
// kernel: tpu_custom_call.1
= control target key start
LH: loop header
LB: loop body
LE: loop exit
PB: predicated region body
PF: predicated region fallthrough
CT: control target
= control target key end

     0   :  { %14 = vsyncpa [#allocation3], 0  ;;  %s1260_s0 = inlined_call_operand.vmem [shape: f32[12,128], index: 0, kind: input, shape index: {}]   ;;  %s1261_s1 = inlined_call_operand.vmem [shape: f32[30,12], index: 1, kind: input, shape index: {}]   ;;  %s1262_s2 = inlined_call_operand.vmem [shape: f32[30,1], index: 2, kind: input, shape index: {}]   ;;  %s1263_s3 = inlined_call_operand.vmem [shape: f32[3,30], index: 3, kind: input, shape index: {}]   ;;  %s1264_s4 = inlined_call_operand.vmem [shape: f32[3,1], index: 4, kind: input, shape index: {}]   ;;  %s1265_s5 = inlined_call_operand.vmem [shape: f32[30,3], index: 5, kind: input, shape index: {}]   ;;  %s1266_s6 = inlined_call_operand.vmem [shape: f32[30,1], index: 6, kind: input, shape index: {}]   ;;  %s1267_s7 = inlined_call_operand.vmem [shape: f32[12,30], index: 7, kind: input, shape index: {}]   ;;  %s1268_s8 = inlined_call_operand.vmem [shape: f32[12,1], index: 8, kind: input, shape index: {}]   ;;  %s1269_s9 = inlined_call_operand.hbm [shape: f32[12,128], index: 9, kind: output, shape index: {}]  }
   0x1   :  { %v1021_v0 = vld [vmem:[%s1261_s1] sm:$0xff]  ;;  %v1026_v1 = vld [vmem:[%s1261_s1 + $0x8] sm:$0xff]  ;;  %v1031_v2 = vld [vmem:[%s1261_s1 + $0x10] sm:$0xff] }
   0x2   :  { %v1036_v3 = vld [vmem:[%s1261_s1 + $0x18] sm:$0x3f]  ;;  %v1041_v4 = vld [vmem:[%s1262_s2] sm:$0xff]  ;;  %v1046_v5 = vld [vmem:[%s1262_s2 + $0x8] sm:$0xff] }
   0x3   :  { %v1051_v6 = vld [vmem:[%s1262_s2 + $0x10] sm:$0xff]  ;;  %v1056_v7 = vld [vmem:[%s1262_s2 + $0x18] sm:$0x3f]  ;;  %v1061_v8 = vld [vmem:[%s1263_s3] sm:$0x7] }
   0x4   :  { %v1066_v9 = vld [vmem:[%s1264_s4] sm:$0x7]  ;;  %v1076_v11 = vld [vmem:[%s1265_s5 + $0x8] sm:$0xff]  ;;  %v1081_v12 = vld [vmem:[%s1265_s5 + $0x10] sm:$0xff] }
   0x5   :  { %v1071_v10 = vld [vmem:[%s1265_s5] sm:$0xff]  ;;  %v1086_v13 = vld [vmem:[%s1265_s5 + $0x18] sm:$0x3f]  ;;  %v1096_v15 = vld [vmem:[%s1266_s6 + $0x8] sm:$0xff] }
   0x6   :  { %v1091_v14 = vld [vmem:[%s1266_s6] sm:$0xff]  ;;  %v1101_v16 = vld [vmem:[%s1266_s6 + $0x10] sm:$0xff]  ;;  %v1106_v17 = vld [vmem:[%s1266_s6 + $0x18] sm:$0x3f] }
   0x7   :  { %v1111_v18 = vld [vmem:[%s1267_s7] sm:$0xff]  ;;  %v1116_v19 = vld [vmem:[%s1267_s7 + $0x8] sm:$0xf]  ;;  %s1138_s7 = smov 0  }
   0x8   :  { %v1121_v20 = vld [vmem:[%s1268_s8] sm:$0xff]  ;;  %v1126_v21 = vld [vmem:[%s1268_s8 + $0x8] sm:$0xf] }
   0x9   :  { %v55_v22 = vld [vmem:[%s1260_s0] sm:$0xff]   ;;  %v56_v23 = vld [vmem:[%s1260_s0 + $0x8] sm:$0xf]  }
   0xa LB: > { %vm98_vm0 = vcmask 1043456   ;;  %vm952_vm1 = vmmov 1   ;;  %vm85_vm3 = vcmask 97280   ;;  %v821_v24 = vpack.c.bf16 %v946_v23, %v942_v22  ;;  %s62_s7 = sadd.s32 1, %s950_s7   ;;  %s950_s7 = sphi %s1138_s7, %s62_s7   ;;  %v946_v23 = vphi %v56_v23, %v1273_v23   ;;  %v942_v22 = vphi %v55_v22, %v1272_v22  }
   0xb   : > { %vm822_vm2 = vmpackc.low %vm98_vm0, %vm952_vm1  ;;  %793 = vmatprep.mubr.msk.f32.mxu0 %vm85_vm3, %v1021_v0  ;;  %v953_v25 = vmov 0   ;;  %v954_v26 = vmov 0.0|0.0   ;;  %vm196_vm4 = vcmask 244736   ;;  %vm955_vm5 = vmmov 0   ;;  %p59_p0 = scmp.ge.s32.totalorder %s62_s7, 2  }
   0xc   : > { %888 = vset.pattern.permute.xlu0 %v953_v25  ;;  %889 = vset.pattern.permute.xlu1 %v953_v25  ;;  %v956_v27 = vmov 0.0   ;;  %v957_v28 = vmov 1   ;;  %v958_v29 = vmov 2   ;;  %vm200_vm6 = vcmask 1045504   ;;  %s965_s0 = smov (%p59_p0), [#allocation2]  }
   0xd   : > { %67 = vperm.xlu0 %888, %v1041_v4   ;;  %823 = vmatprep.subr.msk.bf16.mxu0 %vm822_vm2, %v821_v24  ;;  %vm1176_vm7 = vmpackc.low %vm200_vm6, %vm952_vm1  ;;  %v959_v23 = vmov 683565275   ;;  %s732_s8 = sshll.u32 (%p59_p0), %s965_s0, 4  ;;  %s733_s8 = int_to_ptr.vmem [resolvable:$true] %s732_s8 }
   0xe   : > { %77 = vperm.xlu1 %889, %v1051_v6   ;;  %826 = vmatpush3.bf16.msk.msra.mxu0 %vm822_vm2, %v821_v24  ;;  %s904_s29 = scalar_lea.vmem (%p59_p0), %s733_s8, 256  ;;  %p909_p2 = scmp.lt.s32.totalorder (%p59_p0), %s733_s8, %s733_s8 }
   0xf   : > { %827 = vmatprep.subr.bf16.mxu1 %v954_v26  ;;  %807 = vmatprep.mubr.msk.f32.mxu1 %vm955_vm5, %v956_v27  ;;  %p905_p1 = scmp.ne.s32.totalorder (%p59_p0), %s733_s8, %s904_s29  ;;  %p910_p3 = scmp.lt.s32.totalorder (%p59_p0), %s904_s29, %s904_s29 }
  0x11   : > { %72 = vperm.xlu0 %888, %v1046_v5   ;;  %794 = vmatmul.mubr.msk.f32.vlgmr.msra.gmra.mrb[0].mxu0 %vm85_vm3, %v1026_v1  ;;  %p911_p4 = por (%p59_p0), %p910_p3, %p909_p2 }
  0x12   : > { %82 = vperm.xlu1 %889, %v1056_v7   ;;  %796 = vmatprep.mubr.msk.f32.mxu0 %vm85_vm3, %v1031_v2 }
  0x13   :  { %p912_p5 = pnand (%p59_p0), %p911_p4, %p905_p1 }
  0x15   : > { %193 = vperm.xlu0 %888, %v1066_v9   ;;  %797 = vmatmul.mubr.msk.f32.gmra.mrb[2].mxu0 %vm85_vm3, %v1036_v3 }
  0x16   : > { %521 = vperm.xlu1 %889, %v1071_v10   ;;  %818 = vmatprep.mubr.msk.f32.mxu0 %vm196_vm4, %v1111_v18 }
  0x19   : > { %891 = vset.pattern.permute.xlu0 %v957_v28 }
  0x1a   : > { %890 = vset.pattern.permute.xlu1 %v957_v28  ;;  %552 = vperm.xlu0 %891, %v1076_v11  }
  0x1b   : > { %548 = vperm.xlu1 %890, %v1071_v10  }
  0x1e   : > { %560 = vperm.xlu0 %891, %v1086_v13  }
  0x1f   : > { %892 = vset.pattern.permute.xlu1 %v958_v29 }
  0x20   : > { %576 = vperm.xlu1 %892, %v1071_v10  }
  0x22   : > { %895 = vset.pattern.permute.xlu0 %v953_v25 }
  0x23   : > { %526 = vperm.xlu0 %895, %v1076_v11  }
  0x24   : > { %580 = vperm.xlu1 %892, %v1076_v11  }
  0x27   : > { %531 = vperm.xlu0 %895, %v1081_v12  }
  0x28   : > { %893 = vset.pattern.permute.xlu1 %v953_v25 }
  0x29   : > { %536 = vperm.xlu1 %893, %v1086_v13  }
  0x2b   : > { %605 = vperm.xlu0 %895, %v1091_v14  }
  0x2d   : > { %894 = vset.pattern.permute.xlu1 %v957_v28  ;;  %v961_v28 = vmov 2131351028  }
  0x2e   : > { %556 = vperm.xlu1 %894, %v1081_v12  }
  0x2f   : > { %620 = vperm.xlu0 %895, %v1106_v17  }
  0x32   : > { %896 = vset.pattern.permute.xlu1 %v958_v29 }
  0x33   : > { %584 = vperm.xlu1 %896, %v1081_v12   ;;  %638 = vperm.xlu0 %895, %v1126_v21  }
  0x37   : > { %588 = vperm.xlu1 %896, %v1086_v13  }
  0x3b   : > { %897 = vset.pattern.permute.xlu1 %v953_v25  ;;  %v960_v25 = vmov 2475754826  }
  0x3c   : > { %610 = vperm.xlu1 %897, %v1096_v15  }
  0x40   : > { %615 = vperm.xlu1 %897, %v1101_v16  }
  0x44   : > { %633 = vperm.xlu1 %897, %v1121_v20  }
  0x8c   : > { %v68_v30 = vpop.permute.xlu0 %67 }
  0x8d   : > { %v78_v31 = vpop.permute.xlu1 %77 }
  0x90   : > { %v73_v32 = vpop.permute.xlu0 %72 }
  0x91   : > { %v83_v38 = vpop.permute.xlu1 %82 }
  0x94   : > { %v194_v49 = vpop.permute.xlu0 %193 }
  0xe4   : > { %v795_v33 = vpop.f32.mrb[0].mxu0 }
  0xe5   : > { %v174_v34 = vadd.f32 %v795_v33, %v73_v32  ;;  %v168_v35 = vpop.f32.mrb[1].mxu0 }
  0xe6   : > { %v169_v36 = vadd.f32 %v168_v35, %v68_v30 }
  0xe7   : > { %v188_v37 = vmax.f32 %v174_v34, 0.0  ;;  %v963_v34 = vmov 920167782  }
  0xe8   : > { %v187_v39 = vmax.f32 %v169_v36, 0.0  ;;  %v798_v40 = vpop.f32.mrb[2].mxu0 }
  0xe9   : > { %v184_v41 = vadd.f32 %v798_v40, %v83_v38  ;;  %v178_v42 = vpop.f32.mrb[3].mxu0 }
  0xea   : > { %v179_v43 = vadd.f32 %v178_v42, %v78_v31  ;;  %v828_v44 = vpack.c.bf16 %v188_v37, %v187_v39  ;;  %v962_v31 = vmov 2102212464   ;;  %v964_v37 = vmov 1326507024  }
  0xeb   : > { %v190_v45 = vmax.f32 %v184_v41, 0.0 }
  0xec   : > { %v189_v46 = vmax.f32 %v179_v43, 0.0  ;;  %829 = vmatpush3.bf16.msra.mxu1 %v828_v44 }
  0xed   : > { %830 = vmatprep.subr.bf16.mxu1 %v954_v26 }
  0xee   : > { %v831_v48 = vpack.c.bf16 %v190_v45, %v189_v46 }
  0xf0   : > { %833 = vmatpush3.bf16.msk.msra.mxu1 %vm1176_vm7, %v831_v48 }
  0xf3   : > { %808 = vmatmul.mubr.msk.f32.vlgmr.msra.gmra.mrb[0].mxu1 %vm196_vm4, %v1061_v8 }
 0x1c6   : > { %v270_v50 = vpop.f32.mrb[0].mxu1 }
 0x1c7   : > { %v1184_v51 = vadd.f32 %v270_v50, %v194_v49  ;;  %v809_v52 = vpop.f32.mrb[1].mxu1 }
 0x1c9   : > { %v292_v53 = vmul.f32 0.01, %v1184_v51 }
 0x1cb   : > { %v1187_v54 = vadd.f32 1.5707964, %v292_v53 }
 0x1cd   : > { %v297_v55 = vand.u32 2139095040, %v1187_v54  ;;  %v294_v59 = vand.u32 2147483647, %v1187_v54  ;;  %vm296_vm0 = vcmp.lt.s32.totalorder %v1187_v54, 0 }
 0x1cf   : > { %v298_v56 = vshrl.u32 %v297_v55, 23  ;;  %v301_v62 = vand.u32 8388607, %v294_v59  ;;  %vm295_vm1 = vcmp.le.f32.partialorder %v294_v59, 0.7853982 }
 0x1d1   : > { %v761_v57 = vadd.s32 4294967169, %v298_v56  ;;  %v302_v39 = vor.u32 8388608, %v301_v62 }
 0x1d3   : > { %v304_v58 = vadd.s32 1, %v761_v57  ;;  %v342_v55 = vshll.u32 %v302_v39, 8 }
 0x1d5   : > { %vm305_vm8 = vcmp.gt.s32.totalorder %v304_v58, 0 }
 0x1d6   : > { %v306_v60 = vsel %vm305_vm8, %v304_v58, 0 }
 0x1d7   : > { %v308_v61 = vand.u32 31, %v306_v60  ;;  %v307_v22 = vshrl.u32 %v306_v60, 5 }
 0x1d9   : > { %v309_v63 = vsub.s32 32, %v308_v61  ;;  %v311_v24 = vshll.u32 %v959_v23, %v308_v61  ;;  %v314_v26 = vshll.u32 %v960_v25, %v308_v61  ;;  %v317_v30 = vshll.u32 %v961_v28, %v308_v61 }
 0x1da   : > { %v320_v33 = vshll.u32 %v962_v31, %v308_v61  ;;  %v323_v36 = vshll.u32 %v963_v34, %v308_v61  ;;  %vm326_vm9 = vcmp.lt.s32.totalorder %v307_v22, 1  ;;  %vm329_vm10 = vcmp.lt.s32.totalorder %v307_v22, 4 }
 0x1db   : > { %v312_v27 = vshrl.u32 %v960_v25, %v309_v63  ;;  %v315_v29 = vshrl.u32 %v961_v28, %v309_v63  ;;  %v318_v32 = vshrl.u32 %v962_v31, %v309_v63  ;;  %v321_v35 = vshrl.u32 %v963_v34, %v309_v63 }
 0x1dc   : > { %v324_v38 = vshrl.u32 %v964_v37, %v309_v63  ;;  %v310_v45 = vshrl.u32 %v959_v23, %v309_v63  ;;  %vm328_vm11 = vcmp.lt.s32.totalorder %v307_v22, 3  ;;  %vm327_vm12 = vcmp.lt.s32.totalorder %v307_v22, 2 }
 0x1dd   : > { %v313_v40 = vor.u32 %v312_v27, %v311_v24  ;;  %v316_v41 = vor.u32 %v315_v29, %v314_v26  ;;  %v319_v42 = vor.u32 %v318_v32, %v317_v30  ;;  %v322_v43 = vor.u32 %v321_v35, %v320_v33 }
 0x1de   : > { %v325_v44 = vor.u32 %v324_v38, %v323_v36  ;;  %v274_v33 = vmul.f32 %v1184_v51, %v1184_v51 }
 0x1df   : > { %v334_v46 = vsel %vm326_vm9, %v313_v40, %v316_v41  ;;  %v331_v48 = vsel %vm329_vm10, %v319_v42, 2102212464  ;;  %v335_v49 = vsel %vm329_vm10, %v322_v43, 920167782  ;;  %v338_v50 = vsel %vm326_vm9, %v316_v41, %v319_v42 }
 0x1e0   : > { %v336_v52 = vsel %vm328_vm11, %v319_v42, %v335_v49  ;;  %v339_v53 = vsel %vm329_vm10, %v325_v44, 1326507024  ;;  %v330_v56 = vsel %vm326_vm9, %v310_v45, %v313_v40  ;;  %v332_v57 = vsel %vm328_vm11, %v316_v41, %v331_v48  ;;  %v1206_v41 = vpop.permute.xlu1 %521 }
 0x1e1   : > { %v337_v58 = vsel %vm327_vm12, %v334_v46, %v336_v52  ;;  %v340_v60 = vsel %vm328_vm11, %v322_v43, %v339_v53  ;;  %v333_v23 = vsel %vm327_vm12, %v330_v56, %v332_v57  ;;  %v276_v36 = vrot.slane %v274_v33, 1 }
 0x1e2   : > { %v341_v61 = vsel %vm327_vm12, %v338_v50, %v340_v60  ;;  %v1193_v62 = vmul.u32.u64.low %v342_v55, %v337_v58  ;;  %v1194_v24 = vmul.u32.u64.high %v342_v55, %v337_v58, %v1193_v62  ;;  %v349_v27 = vmul.u32 %v342_v55, %v333_v23 }
 0x1e3   : > { %v1196_v25 = vmul.u32.u64.low %v342_v55, %v341_v61  ;;  %v1197_v63 = vmul.u32.u64.high %v342_v55, %v341_v61, %v1196_v25  ;;  %v1204_v39 = vadd.f32 %v276_v36, %v274_v33  ;;  %vm386_vm10 = vweird.f32 %v1187_v54 }
 0x1e4   : > { %v352_v26 = vadd.s32 1, %v1194_v24  ;;  %v1213_v53 = vpop.permute.xlu1 %548 }
 0x1e5   : > { %vm351_vm13 = vc.u32 %v1197_v63, %v1193_v62  ;;  %v350_v42 = vadd.s32 %v1193_v62, %v1197_v63  ;;  %vm279_vm15 = vcmp.eq.f32.partialorder %v1204_v39, 0.0 }
 0x1e6   : > { %v353_v22 = vsel %vm351_vm13, %v352_v26, %v1194_v24  ;;  %v280_v49 = vsel %vm279_vm15, 1.0, %v1204_v39 }
 0x1e7   : > { %v354_v28 = vadd.s32 %v353_v22, %v349_v27  ;;  %898 = vrsqrt.f32 %v280_v49 }
 0x1e8   : > { %v1215_v61 = vpop.permute.xlu1 %576 }
 0x1e9   : > { %v355_v29 = vadd.s32 536870912, %v354_v28 }
 0x1eb   : > { %v356_v30 = vshrl.u32 %v355_v29, 30  ;;  %v553_v29 = vpop.permute.xlu0 %552 }
 0x1ec   : > { %v1221_v23 = vpop.permute.xlu1 %580 }
 0x1ed   : > { %v357_v31 = vshll.u32 %v356_v30, 30  ;;  %v380_v60 = vsub.s32 4, %v356_v30 }
 0x1ef   : > { %v358_v32 = vsub.s32 %v354_v28, %v357_v31  ;;  %v381_v25 = vsel %vm296_vm0, %v380_v60, %v356_v30 }
 0x1f0   : > { %v383_v27 = vsel %vm295_vm1, 0, %v381_v25  ;;  %v537_v31 = vpop.permute.xlu1 %536 }
 0x1f1   : > { %v360_v34 = vsub.s32 0, %v358_v32  ;;  %v899_v26 = vpop.eup %898  ;;  %v490_v28 = vadd.s32 3, %v383_v27 }
 0x1f2   : > { %v285_v22 = vrot.slane %v899_v26, 7  ;;  %v282_v30 = vmul.f32 %v899_v26, %v1184_v51 }
 0x1f3   : > { %v762_v35 = vmin.u32 %v360_v34, %v358_v32  ;;  %v387_v34 = vand.u32 3, %v383_v27 }
 0x1f4   : > { %v287_v33 = vmul.f32 %v285_v22, %v1184_v51  ;;  %v283_v60 = vsel %vm279_vm15, 1.0, %v282_v30 }
 0x1f5   : > { %v362_v37 = vclz %v762_v35  ;;  %v491_v35 = vand.u32 3, %v490_v28  ;;  %vm392_vm2 = vcmp.eq.s32.totalorder %v387_v34, 2  ;;  %vm389_vm5 = vcmp.eq.s32.totalorder %v387_v34, 0 }
 0x1f6   : > { %vm388_vm8 = vcmp.lt.s32.totalorder %v387_v34, 2 }
 0x1f7   : > { %v763_v38 = vadd.s32 4294967294, %v362_v37  ;;  %vm496_vm3 = vcmp.eq.s32.totalorder %v491_v35, 2  ;;  %vm493_vm6 = vcmp.eq.s32.totalorder %v491_v35, 0  ;;  %vm492_vm9 = vcmp.lt.s32.totalorder %v491_v35, 2 }
 0x1f9   : > { %vm764_vm14 = vcmp.lt.s32.totalorder %v763_v38, 0 }
 0x1fa   : > { %v365_v40 = vsel %vm764_vm14, 0, %v763_v38 }
 0x1fb   : > { %v366_v43 = vsub.s32 32, %v365_v40  ;;  %v370_v44 = vsub.s32 4294967266, %v365_v40  ;;  %v367_v45 = vshll.u32 %v358_v32, %v365_v40  ;;  %v539_v32 = vlaneseq }
 0x1fc   : > { %v289_v40 = vrot.slane %v287_v33, 1 }
 0x1fd   : > { %v368_v46 = vshrl.u32 %v350_v42, %v366_v43  ;;  %v371_v48 = vadd.s32 127, %v370_v44  ;;  %v540_v38 = vshrl.u32 %v539_v32, 7  ;;  %v561_v43 = vpop.permute.xlu0 %560  ;;  %v557_v44 = vpop.permute.xlu1 %556 }
 0x1ff   : > { %v369_v50 = vor.u32 %v368_v46, %v367_v45  ;;  %v372_v52 = vshll.u32 %v371_v48, 23 }
 0x201   : > { %v373_v55 = vor.u32 4788187, %v372_v52  ;;  %v376_v57 = vcvt.s32.f32 %v369_v50  ;;  %v527_v25 = vpop.permute.xlu0 %526 }
 0x203   : > { %v374_v56 = vand.u32 2147483647, %v373_v55 }
 0x205   : > { %v377_v58 = vmul.f32 %v376_v57, %v374_v56 }
 0x207   : > { %v378_v62 = vxor.u32 2147483648, %v377_v58 }
 0x209   : > { %v379_v24 = vsel %vm296_vm0, %v378_v62, %v377_v58  ;;  %v541_v62 = vsub.s32 0, %v540_v38 }
 0x20a   : > { %v382_v63 = vsel %vm295_vm1, %v1187_v54, %v379_v24  ;;  %v291_v24 = vsel %vm279_vm15, 0.0, %v289_v40 }
 0x20b   : > { %900 = vcosq.f32 %v382_v63 }
 0x20c   : > { %902 = vsinq.f32 %v382_v63  ;;  %v585_v63 = vpop.permute.xlu1 %584 }
 0x215   : > { %v901_v59 = vpop.eup %900 }
 0x216   : > { %v903_v36 = vpop.eup %902  ;;  %v393_v37 = vxor.u32 2147483648, %v901_v59 }
 0x217   : > { %v390_v42 = vxor.u32 2147483648, %v903_v36 }
 0x218   : > { %v394_v45 = vsel %vm392_vm2, %v393_v37, %v903_v36  ;;  %v498_v46 = vsel %vm496_vm3, %v393_v37, %v903_v36  ;;  %v589_v36 = vpop.permute.xlu1 %588 }
 0x219   : > { %v391_v48 = vsel %vm389_vm5, %v901_v59, %v390_v42  ;;  %v495_v49 = vsel %vm493_vm6, %v901_v59, %v390_v42  ;;  %v532_v59 = vpop.permute.xlu0 %531  ;;  %v593_v42 = vsub.s32 2, %v540_v38 }
 0x21a   : > { %v395_v50 = vsel %vm388_vm8, %v391_v48, %v394_v45  ;;  %v499_v52 = vsel %vm492_vm9, %v495_v49, %v498_v46 }
 0x21b   : > { %v396_v55 = vsel %vm386_vm10, nan, %v395_v50  ;;  %v500_v56 = vsel %vm386_vm10, nan, %v499_v52 }
 0x21c   : > { %v502_v57 = vrot.slane %v396_v55, 2  ;;  %v506_v58 = vrot.slane %v500_v56, 2 }
 0x21d   : > { %v606_v56 = vpop.permute.xlu0 %605 }
 0x21e   : > { %v510_v26 = vmul.f32 %v502_v57, %v283_v60  ;;  %v504_v27 = vmul.f32 %v502_v57, %v291_v24  ;;  %v508_v22 = vmul.f32 %v506_v58, %v283_v60  ;;  %v511_v28 = vmul.f32 %v506_v58, %v291_v24  ;;  %v611_v57 = vpop.permute.xlu1 %610 }
 0x220   : > { %v509_v54 = vadd.f32 %v508_v22, %v504_v27  ;;  %v512_v32 = vsub.f32 %v510_v26, %v511_v28 }
 0x221   : > { %v621_v27 = vpop.permute.xlu0 %620 }
 0x222   : > { %v513_v33 = vmul.f32 -9.81, %v509_v54  ;;  %v542_v34 = vrot.slane %v512_v32, %v541_v62  ;;  %v566_v35 = vrot.slane %v509_v54, %v541_v62  ;;  %v616_v22 = vpop.permute.xlu1 %615 }
 0x224   : > { %v514_v37 = vmul.f32 0.01, %v513_v33  ;;  %v543_v30 = vmul.f32 %v542_v34, %v1206_v41  ;;  %v567_v39 = vmul.f32 %v566_v35, %v1213_v53  ;;  %v568_v45 = vmul.f32 %v566_v35, %v553_v29 }
 0x225   : > { %v570_v46 = vmul.f32 %v566_v35, %v561_v43  ;;  %v546_v48 = vmul.f32 %v542_v34, %v537_v31  ;;  %v544_v49 = vmul.f32 %v542_v34, %v527_v25  ;;  %v569_v50 = vmul.f32 %v566_v35, %v557_v44 }
 0x226   : > { %v516_v40 = vrot.slane %v514_v37, 6  ;;  %v545_v52 = vmul.f32 %v542_v34, %v532_v59  ;;  %v571_v60 = vadd.f32 %v567_v39, %v543_v30 }
 0x227   : > { %v574_v62 = vadd.f32 %v570_v46, %v546_v48  ;;  %v572_v24 = vadd.f32 %v568_v45, %v544_v49 }
 0x228   : > { %v518_v55 = vadd.f32 %v516_v40, %v1184_v51  ;;  %v573_v26 = vadd.f32 %v569_v50, %v545_v52 }
 0x22a   : > { %v594_v58 = vrot.slane %v518_v55, %v593_v42 }
 0x22c   : > { %v595_v41 = vmul.f32 %v594_v58, %v1215_v61  ;;  %v596_v53 = vmul.f32 %v594_v58, %v1221_v23  ;;  %v597_v38 = vmul.f32 %v594_v58, %v585_v63  ;;  %v598_v29 = vmul.f32 %v594_v58, %v589_v36  ;;  %v639_v23 = vpop.permute.xlu0 %638  ;;  %v634_v36 = vpop.permute.xlu1 %633 }
 0x22e   : > { %v599_v43 = vadd.f32 %v595_v41, %v571_v60  ;;  %v602_v31 = vadd.f32 %v598_v29, %v574_v62  ;;  %v600_v25 = vadd.f32 %v596_v53, %v572_v24  ;;  %v601_v44 = vadd.f32 %v597_v38, %v573_v26 }
 0x230   : > { %v623_v51 = vadd.f32 %v606_v56, %v599_v43  ;;  %v626_v28 = vadd.f32 %v621_v27, %v602_v31  ;;  %v624_v54 = vadd.f32 %v611_v57, %v600_v25  ;;  %v625_v32 = vadd.f32 %v616_v22, %v601_v44 }
 0x232   : > { %v627_v33 = vmax.f32 %v623_v51, 0.0  ;;  %v630_v34 = vmax.f32 %v626_v28, 0.0  ;;  %v628_v35 = vmax.f32 %v624_v54, 0.0  ;;  %v629_v59 = vmax.f32 %v625_v32, 0.0 }
 0x234   : > { %v834_v37 = vpack.c.bf16 %v628_v35, %v627_v33  ;;  %v838_v61 = vpack.c.bf16 %v630_v34, %v629_v59 }
 0x236   : > { %835 = vmatprep.subr.bf16.mxu0 %v834_v37 }
 0x237   : > { %837 = vmatpush3.bf16.msra.mxu0 %v834_v37 }
 0x238   : > { %840 = vmatprep.subr.msk.bf16.mxu0 %vm1176_vm7, %v838_v61 }
 0x23b   : > { %843 = vmatpush3.bf16.msk.msra.mxu0 %vm1176_vm7, %v838_v61 }
 0x23e   : > { %819 = vmatmul.mubr.msk.f32.vlgmr.msra.gmra.mrb[4].mxu0 %vm196_vm4, %v1116_v19 }
 0x30f   :  { %61 = sbr.rel (!%p59_p0) target bundleno = 10 (0xa), region = 63 }
 0x311   : > { %v820_v63 = vpop.f32.mrb[4].mxu0 }
 0x312   : > { %v722_v30 = vadd.f32 %v820_v63, %v639_v23   ;;  %v716_v42 = vpop.f32.mrb[5].mxu0 }
 0x313   : > { %v717_v39 = vadd.f32 %v716_v42, %v634_v36  }
 0x314   : > { %v1273_v23 = vmov %v722_v30  ;;  %726 = vst [vmem:[#allocation2 + $0x8] sm:$0xf] (%p59_p0), %v722_v30 }
 0x315   : > { %v1272_v22 = vmov %v717_v39  ;;  %725 = vst [vmem:[#allocation2] sm:$0xff] (%p59_p0), %v717_v39 }
 0x316   :  { %915 = shalt.err (!%p912_p5)
}
 0x317   :  { %s916_s2 = scalar_lea.hbm %s1269_s9, 256 }
 0x318   :  { %p917_p6 = scmp.ne.s32.totalorder %s1269_s9, %s916_s2  ;;  %p920_p7 = scmp.lt.u32.totalorder %s916_s2, %s1269_s9 }
 0x31a   :  { %p922_p8 = pnand %p920_p7, %p917_p6 }
 0x31c   :  { %925 = shalt.err (!%p922_p8)
}
 0x31d   :  { %s966_s13 = smov 128   ;;  %s967_s14 = smov 8  }
 0x31e   :  { %738 = dma.vmem_to_hbm [thread:$0]  %s733_s8, 256, %s1269_s9, [#allocation3], %s966_s13, %s966_s13, %s967_s14  }
 0x31f   :  { %938 = dma.done.wait [#allocation3], 256  }
 0x320   :  { %939 = vsyncadd [#allocation3], 4294967040 }
 0x321   :  { %742 = vsyncpa [#allocation3], 1 }

</bundles_post_ra>
